<compile_context>
chip_gen: v7x
topology: tpu7x:2x2x1
jax: 0.10.0
libtpu: 0.0.40
codegen_flags: <defaults>
</compile_context>

<pallas_src>
import functools

import jax
import jax.numpy as jnp
from jax import lax
from jax.experimental import pallas as pl
from jax.experimental.pallas import tpu as pltpu


# dot_general dimension numbers:
#   NT: a(m,k) . b(n,k)^T -> (m,n)     TN: a(k,m)^T . b(k,n) -> (m,n)
_NT_DIMS = (((1,), (1,)), ((), ()))
_TN_DIMS = (((0,), (0,)), ((), ()))


def _planar_flows_kernel(n_flows, z_ref, w_ref, uhat_ref, b_ref, c_ref, gt_ref,
                         zk_ref, ldj_ref):
    """Applies n_flows planar flows to one batch tile (lane-major chain).

    z_ref   : (TB, D)   batch tile of z0
    w_ref   : (NS, D)   w per flow, flow axis zero-padded to NS sublanes
    uhat_ref: (NS, D)   precomputed uhat per flow (padded rows zero)
    b_ref   : (NS, 1)   per-flow bias
    c_ref   : (NS, 1)   c_k = w_k . uhat_k
    gt_ref  : (NS, NS)  gt[j, k] = w_j . uhat_k for j > k, else 0
    zk_ref  : (TB, D)   output z_K
    ldj_ref : (1, TB)   output sum of log|det J| per batch row (lane-dense)
    """
    z0 = z_ref[...].astype(jnp.float32)          # (TB, D)
    w = w_ref[...].astype(jnp.float32)           # (NS, D)
    uhat = uhat_ref[...].astype(jnp.float32)     # (NS, D)
    b_col = b_ref[...].astype(jnp.float32)       # (NS, 1)
    c_col = c_ref[...].astype(jnp.float32)       # (NS, 1)
    gt = gt_ref[...].astype(jnp.float32)         # (NS, NS)

    # Lane-major pre-activations: zwT[k, :] = w_k . z0 + b_k.
    zwT = lax.dot_general(w, z0, dimension_numbers=_NT_DIMS,
                          preferred_element_type=jnp.float32) + b_col   # (NS, TB)

    # Serial flow chain.  gt is strictly lower-triangular, so row k of zwT is
    # final by the time iteration k reads it, and already-consumed rows are
    # never touched again.  Each step is (1, TB) tanh + (NS, TB) FMA: lane-dense.
    # n_flows is small (4 here): static unroll is fine.  For large n_flows,
    # switch to lax.fori_loop with pl.ds indexing to bound live ranges.
    for k in range(n_flows - 1):
        t_k = jnp.tanh(zwT[k:k + 1, :])                    # (1, TB)   EUP
        zwT = zwT + gt[:, k:k + 1] * t_k                   # (NS, TB)  VPU

    # Rows of zwT now hold the final zwb_k for every flow.
    t_blk = jnp.tanh(zwT)                                  # (NS, TB)

    # log|det J_k| = log(|1 + (1 - t_k^2) * (w_k . uhat_k)| + 1e-8), computed
    # in one full-block pass; padded flow rows are masked before the reduce.
    row = lax.broadcasted_iota(jnp.int32, (zwT.shape[0], 1), 0)
    terms = jnp.log(jnp.abs(1.0 + (1.0 - t_blk * t_blk) * c_col) + 1e-8)
    terms = jnp.where(row < n_flows, terms, 0.0)
    ldj_ref[...] = jnp.sum(terms, axis=0, keepdims=True).astype(ldj_ref.dtype)

    # z_K = z_0 + sum_k t_k * uhat_k  ==  z0 + t_blk^T @ uhat  (MXU).
    # Padded rows contribute nothing (uhat padded rows are zero).
    delta = lax.dot_general(t_blk, uhat, dimension_numbers=_TN_DIMS,
                            preferred_element_type=jnp.float32)         # (TB, D)
    zk_ref[...] = (z0 + delta).astype(zk_ref.dtype)


def _round_up(x, m):
    return ((x + m - 1) // m) * m


def _cdiv(a, b):
    return (a + b - 1) // b


def normalizing_flows_forward(z0, cond, u, w, b, *, batch_tile=4096):
    """Forward of NormalizingFlows (flow_type='planar', cond_params=False).

    z0  : (B, D) float32 or bfloat16 (compute is f32 in-kernel)
    cond: (B, cond_dim)  -- unused in this branch (kept for signature parity)
    u, w: (n_flows, D)
    b   : (n_flows, 1)
    returns (zk (B, D), sum_log_jacobian (B,))
    """
    del cond  # unused when cond_params is False (matches the PyTorch branch)
    B, D = z0.shape
    n_flows = u.shape[0]

    # ---- z-independent parameter preprocessing (hoisted out of the kernel) ----
    uf = u.astype(jnp.float32)
    wf = w.astype(jnp.float32)
    bf = b.astype(jnp.float32)

    uw = jnp.sum(uf * wf, axis=1, keepdims=True)                            # (n, 1)
    muw = -1.0 + jax.nn.softplus(uw)                                        # (n, 1)
    uhat = uf + (muw - uw) * wf / jnp.sum(wf * wf, axis=1, keepdims=True)   # (n, D)

    ns = _round_up(max(n_flows, 1), 8)   # sublane-pad the flow axis
    pad_r = ns - n_flows
    w_pad = jnp.pad(wf, ((0, pad_r), (0, 0)))                               # (NS, D)
    uhat_pad = jnp.pad(uhat, ((0, pad_r), (0, 0)))                          # (NS, D)
    b_col = jnp.pad(bf.reshape(n_flows, 1), ((0, pad_r), (0, 0)))           # (NS, 1)
    c_col = jnp.pad(jnp.sum(wf * uhat, axis=1, keepdims=True),
                    ((0, pad_r), (0, 0)))                                   # (NS, 1)
    # gt[j, k] = w_j . uhat_k for j > k: flow k's tanh feeds the
    # pre-activations of all later flows j (strictly lower triangular).
    gt = jnp.pad(jnp.tril(jnp.dot(wf, uhat.T), k=-1),
                 ((0, pad_r), (0, pad_r)))                                  # (NS, NS)

    # ---- batch tiling ----
    # Single tile for small batches; otherwise tiles are multiples of 128 rows
    # (lane-dense (1, tb) ldj blocks) and the grid has >= 4 'parallel' steps so
    # v7x's two TensorCores each get >= 2 steps.  Pad rows are sliced off below.
    bp8 = _round_up(max(B, 1), 8)
    if bp8 <= batch_tile:
        tb, Bp = bp8, bp8
    else:
        n_steps = max(4, _cdiv(bp8, batch_tile))
        tb = _round_up(_cdiv(bp8, n_steps), 128)
        Bp = tb * n_steps
    zp = z0 if Bp == B else jnp.pad(z0, ((0, Bp - B), (0, 0)))
    grid = (Bp // tb,)

    kernel = functools.partial(_planar_flows_kernel, n_flows)

    zk, ldj = pl.pallas_call(
        kernel,
        out_shape=(
            jax.ShapeDtypeStruct((Bp, D), z0.dtype),
            jax.ShapeDtypeStruct((1, Bp), jnp.float32),
        ),
        grid_spec=pltpu.PrefetchScalarGridSpec(
            num_scalar_prefetch=0,
            grid=grid,
            in_specs=[
                pl.BlockSpec((tb, D), lambda i: (i, 0)),        # z0 tile
                pl.BlockSpec((ns, D), lambda i: (0, 0)),        # w (padded)
                pl.BlockSpec((ns, D), lambda i: (0, 0)),        # uhat (padded)
                pl.BlockSpec((ns, 1), lambda i: (0, 0)),        # b column
                pl.BlockSpec((ns, 1), lambda i: (0, 0)),        # c column
                pl.BlockSpec((ns, ns), lambda i: (0, 0)),       # gt coupling
            ],
            out_specs=[
                pl.BlockSpec((tb, D), lambda i: (i, 0)),        # zk tile
                pl.BlockSpec((1, tb), lambda i: (0, i)),        # ldj (lane-dense)
            ],
        ),
        compiler_params=pltpu.CompilerParams(
            dimension_semantics=("parallel",),
        ),
    )(zp, w_pad, uhat_pad, b_col, c_col, gt)

    return zk[:B], ldj[0, :B]


def _reference_forward(z0, u, w, b):
    """Pure-JAX reference mirroring the PyTorch code, for verification."""
    z = z0.astype(jnp.float32)
    sum_ldj = jnp.zeros((z0.shape[0],), jnp.float32)
    for k in range(u.shape[0]):
        uk, wk, bk = u[k:k + 1], w[k:k + 1], b[k:k + 1]
        uw = jnp.sum(uk * wk, axis=1, keepdims=True)
        muw = -1.0 + jax.nn.softplus(uw)
        uhat = uk + (muw - uw) * wk / jnp.sum(wk ** 2, axis=1, keepdims=True)
        zwb = jnp.sum(z * wk, axis=1, keepdims=True) + bk
        z = z + uhat * jnp.tanh(zwb)
        psi = (1.0 - jnp.tanh(zwb) ** 2) * wk
        psi_u = jnp.sum(psi * uhat, axis=1)
        sum_ldj = sum_ldj + jnp.log(jnp.abs(1.0 + psi_u) + 1e-8)
    return z, sum_ldj


if __name__ == "__main__":
    # Small, module-consistent shapes.
    B, COND_DIM, LATENT_DIM, N_FLOWS = 8, 16, 32, 4

    key = jax.random.PRNGKey(0)
    k_z, k_c, k_u, k_w, k_b = jax.random.split(key, 5)

    z0 = jax.random.normal(k_z, (B, LATENT_DIM), dtype=jnp.float32)
    cond = jax.random.normal(k_c, (B, COND_DIM), dtype=jnp.float32)  # unused branch

    # Parameters: uniform(-0.01, 0.01), one (1, D)/(1, 1) set per flow, stacked.
    u = jax.random.uniform(k_u, (N_FLOWS, LATENT_DIM), minval=-0.01, maxval=0.01)
    w = jax.random.uniform(k_w, (N_FLOWS, LATENT_DIM), minval=-0.01, maxval=0.01)
    b = jax.random.uniform(k_b, (N_FLOWS, 1), minval=-0.01, maxval=0.01)

    zk, sum_log_jac = normalizing_flows_forward(z0, cond, u, w, b)
    zk = jax.block_until_ready(zk)
    sum_log_jac = jax.block_until_ready(sum_log_jac)

    zk_ref, ldj_ref = _reference_forward(z0, u, w, b)
    assert zk.shape == (B, LATENT_DIM) and sum_log_jac.shape == (B,)
    assert jnp.allclose(zk, zk_ref, atol=2e-5, rtol=2e-5)
    assert jnp.allclose(sum_log_jac, ldj_ref, atol=2e-5, rtol=2e-5)

    # Also exercise the batch-padding / multi-tile path (B not a tile multiple).
    B2 = 300
    z0b = jax.random.normal(jax.random.PRNGKey(1), (B2, LATENT_DIM), jnp.float32)
    zk2, ldj2 = normalizing_flows_forward(z0b, None, u, w, b, batch_tile=64)
    zk2 = jax.block_until_ready(zk2)
    ldj2 = jax.block_until_ready(ldj2)
    zk2_ref, ldj2_ref = _reference_forward(z0b, u, w, b)
    assert zk2.shape == (B2, LATENT_DIM) and ldj2.shape == (B2,)
    assert jnp.allclose(zk2, zk2_ref, atol=2e-5, rtol=2e-5)
    assert jnp.allclose(ldj2, ldj2_ref, atol=2e-5, rtol=2e-5)

    print("KERNEL_OK")
</pallas_src>

<mosaic_0001>
module attributes {stable_mosaic.version = 11 : i64} {
  func.func @_planar_flows_kernel(%arg0: i32, %arg1: memref<8x32xf32, #tpu.memory_space<vmem>>, %arg2: memref<8x32xf32, #tpu.memory_space<vmem>>, %arg3: memref<8x32xf32, #tpu.memory_space<vmem>>, %arg4: memref<8x1xf32, #tpu.memory_space<vmem>>, %arg5: memref<8x1xf32, #tpu.memory_space<vmem>>, %arg6: memref<8x8xf32, #tpu.memory_space<vmem>>, %arg7: memref<8x32xf32, #tpu.memory_space<vmem>>, %arg8: memref<1x8xf32, #tpu.memory_space<vmem>>) attributes {dimension_semantics = [#tpu.dimension_semantics<parallel>], iteration_bounds = array<i64: 1>, scalar_prefetch = 0 : i64, scratch_operands = 0 : i64, tpu.core_type = #tpu.core_type<tc>, window_params = [{transform_indices = @transform_0, window_bounds = array<i64: 8, 32>}, {pipeline_mode = #tpu.pipeline_mode<synchronous>, transform_indices = @transform_1, window_bounds = array<i64: 8, 32>}, {pipeline_mode = #tpu.pipeline_mode<synchronous>, transform_indices = @transform_2, window_bounds = array<i64: 8, 32>}, {pipeline_mode = #tpu.pipeline_mode<synchronous>, transform_indices = @transform_3, window_bounds = array<i64: 8, 1>}, {pipeline_mode = #tpu.pipeline_mode<synchronous>, transform_indices = @transform_4, window_bounds = array<i64: 8, 1>}, {pipeline_mode = #tpu.pipeline_mode<synchronous>, transform_indices = @transform_5, window_bounds = array<i64: 8, 8>}, {transform_indices = @transform_6, window_bounds = array<i64: 8, 32>}, {transform_indices = @transform_7, window_bounds = array<i64: 1, 8>}]} {
    %c0 = arith.constant 0 : index
    %c0_0 = arith.constant 0 : index
    %0 = vector.load %arg1[%c0, %c0_0] : memref<8x32xf32, #tpu.memory_space<vmem>>, vector<8x32xf32>
    %c0_1 = arith.constant 0 : index
    %c0_2 = arith.constant 0 : index
    %1 = vector.load %arg2[%c0_1, %c0_2] : memref<8x32xf32, #tpu.memory_space<vmem>>, vector<8x32xf32>
    %c0_3 = arith.constant 0 : index
    %c0_4 = arith.constant 0 : index
    %2 = vector.load %arg3[%c0_3, %c0_4] : memref<8x32xf32, #tpu.memory_space<vmem>>, vector<8x32xf32>
    %c0_5 = arith.constant 0 : index
    %c0_6 = arith.constant 0 : index
    %3 = vector.load %arg4[%c0_5, %c0_6] : memref<8x1xf32, #tpu.memory_space<vmem>>, vector<8x1xf32>
    %c0_7 = arith.constant 0 : index
    %c0_8 = arith.constant 0 : index
    %4 = vector.load %arg5[%c0_7, %c0_8] : memref<8x1xf32, #tpu.memory_space<vmem>>, vector<8x1xf32>
    %c0_9 = arith.constant 0 : index
    %c0_10 = arith.constant 0 : index
    %5 = vector.load %arg6[%c0_9, %c0_10] : memref<8x8xf32, #tpu.memory_space<vmem>>, vector<8x8xf32>
    %cst = arith.constant dense<0.000000e+00> : vector<8x8xf32>
    %6 = tpu.matmul %1, %0, %cst {dimension_numbers = #tpu.dot_dimension_numbers<[1], [1], [0], [0], [0, 0, 1, 0], [], []>} : vector<8x32xf32>, vector<8x32xf32>, vector<8x8xf32> -> vector<8x8xf32>
    %7 = vector.broadcast %3 : vector<8x1xf32> to vector<8x8xf32>
    %8 = arith.addf %6, %7 : vector<8x8xf32>
    %9 = vector.extract_strided_slice %8 {offsets = [0, 0], sizes = [1, 8], strides = [1, 1]} : vector<8x8xf32> to vector<1x8xf32>
    %10 = math.tanh %9 : vector<1x8xf32>
    %11 = vector.extract_strided_slice %5 {offsets = [0, 0], sizes = [8, 1], strides = [1, 1]} : vector<8x8xf32> to vector<8x1xf32>
    %12 = vector.broadcast %11 : vector<8x1xf32> to vector<8x8xf32>
    %13 = vector.broadcast %10 : vector<1x8xf32> to vector<8x8xf32>
    %14 = arith.mulf %12, %13 : vector<8x8xf32>
    %15 = arith.addf %8, %14 : vector<8x8xf32>
    %16 = vector.extract_strided_slice %15 {offsets = [1, 0], sizes = [1, 8], strides = [1, 1]} : vector<8x8xf32> to vector<1x8xf32>
    %17 = math.tanh %16 : vector<1x8xf32>
    %18 = vector.extract_strided_slice %5 {offsets = [0, 1], sizes = [8, 1], strides = [1, 1]} : vector<8x8xf32> to vector<8x1xf32>
    %19 = vector.broadcast %18 : vector<8x1xf32> to vector<8x8xf32>
    %20 = vector.broadcast %17 : vector<1x8xf32> to vector<8x8xf32>
    %21 = arith.mulf %19, %20 : vector<8x8xf32>
    %22 = arith.addf %15, %21 : vector<8x8xf32>
    %23 = vector.extract_strided_slice %22 {offsets = [2, 0], sizes = [1, 8], strides = [1, 1]} : vector<8x8xf32> to vector<1x8xf32>
    %24 = math.tanh %23 : vector<1x8xf32>
    %25 = vector.extract_strided_slice %5 {offsets = [0, 2], sizes = [8, 1], strides = [1, 1]} : vector<8x8xf32> to vector<8x1xf32>
    %26 = vector.broadcast %25 : vector<8x1xf32> to vector<8x8xf32>
    %27 = vector.broadcast %24 : vector<1x8xf32> to vector<8x8xf32>
    %28 = arith.mulf %26, %27 : vector<8x8xf32>
    %29 = arith.addf %22, %28 : vector<8x8xf32>
    %30 = math.tanh %29 : vector<8x8xf32>
    %31 = tpu.iota {dimensions = array<i32: 0>} : vector<8x1xi32>
    %32 = arith.mulf %30, %30 : vector<8x8xf32>
    %cst_11 = arith.constant 1.000000e+00 : f32
    %33 = vector.broadcast %cst_11 : f32 to vector<8x8xf32>
    %34 = arith.subf %33, %32 : vector<8x8xf32>
    %35 = vector.broadcast %4 : vector<8x1xf32> to vector<8x8xf32>
    %36 = arith.mulf %34, %35 : vector<8x8xf32>
    %cst_12 = arith.constant 1.000000e+00 : f32
    %37 = vector.broadcast %cst_12 : f32 to vector<8x8xf32>
    %38 = arith.addf %37, %36 : vector<8x8xf32>
    %39 = math.absf %38 : vector<8x8xf32>
    %cst_13 = arith.constant 9.99999993E-9 : f32
    %40 = vector.broadcast %cst_13 : f32 to vector<8x8xf32>
    %41 = arith.addf %39, %40 : vector<8x8xf32>
    %42 = math.log %41 : vector<8x8xf32>
    %c4_i32 = arith.constant 4 : i32
    %43 = vector.broadcast %c4_i32 : i32 to vector<8x1xi32>
    %44 = arith.cmpi slt, %31, %43 : vector<8x1xi32>
    %cst_14 = arith.constant 0.000000e+00 : f32
    %45 = vector.shape_cast %44 : vector<8x1xi1> to vector<8x1xi1>
    %46 = vector.broadcast %45 : vector<8x1xi1> to vector<8x8xi1>
    %47 = vector.broadcast %cst_14 : f32 to vector<8x8xf32>
    %48 = arith.select %46, %42, %47 : vector<8x8xi1>, vector<8x8xf32>
    %cst_15 = arith.constant dense<0.000000e+00> : vector<8xf32>
    %49 = vector.multi_reduction <add>, %48, %cst_15 [0] : vector<8x8xf32> to vector<8xf32>
    %50 = vector.shape_cast %49 : vector<8xf32> to vector<1x8xf32>
    %c0_16 = arith.constant 0 : index
    %c0_17 = arith.constant 0 : index
    %51 = vector.load %arg8[%c0_16, %c0_17] : memref<1x8xf32, #tpu.memory_space<vmem>>, vector<1x8xf32>
    tpu.vector_store %arg8[%c0_16, %c0_17], %50 {strides = array<i32>} : memref<1x8xf32, #tpu.memory_space<vmem>>, vector<1x8xf32>,
    %cst_18 = arith.constant dense<0.000000e+00> : vector<8x32xf32>
    %52 = tpu.matmul %30, %2, %cst_18 {dimension_numbers = #tpu.dot_dimension_numbers<[0], [0], [1], [1], [0, 1, 1, 1], [], []>} : vector<8x8xf32>, vector<8x32xf32>, vector<8x32xf32> -> vector<8x32xf32>
    %53 = arith.addf %0, %52 : vector<8x32xf32>
    %c0_19 = arith.constant 0 : index
    %c0_20 = arith.constant 0 : index
    %54 = vector.load %arg7[%c0_19, %c0_20] : memref<8x32xf32, #tpu.memory_space<vmem>>, vector<8x32xf32>
    tpu.vector_store %arg7[%c0_19, %c0_20], %53 {strides = array<i32>} : memref<8x32xf32, #tpu.memory_space<vmem>>, vector<8x32xf32>,
    return
  }
  func.func @transform_0(%arg0: i32) -> (i32, i32) {
    %c0_i32 = arith.constant 0 : i32
    %c0_i32_0 = arith.constant 0 : i32
    return %arg0, %c0_i32 : i32, i32
  }
  func.func @transform_1(%arg0: i32) -> (i32, i32) {
    %c0_i32 = arith.constant 0 : i32
    %c0_i32_0 = arith.constant 0 : i32
    %c0_i32_1 = arith.constant 0 : i32
    return %c0_i32, %c0_i32_0 : i32, i32
  }
  func.func @transform_2(%arg0: i32) -> (i32, i32) {
    %c0_i32 = arith.constant 0 : i32
    %c0_i32_0 = arith.constant 0 : i32
    %c0_i32_1 = arith.constant 0 : i32
    return %c0_i32, %c0_i32_0 : i32, i32
  }
  func.func @transform_3(%arg0: i32) -> (i32, i32) {
    %c0_i32 = arith.constant 0 : i32
    %c0_i32_0 = arith.constant 0 : i32
    %c0_i32_1 = arith.constant 0 : i32
    return %c0_i32, %c0_i32_0 : i32, i32
  }
  func.func @transform_4(%arg0: i32) -> (i32, i32) {
    %c0_i32 = arith.constant 0 : i32
    %c0_i32_0 = arith.constant 0 : i32
    %c0_i32_1 = arith.constant 0 : i32
    return %c0_i32, %c0_i32_0 : i32, i32
  }
  func.func @transform_5(%arg0: i32) -> (i32, i32) {
    %c0_i32 = arith.constant 0 : i32
    %c0_i32_0 = arith.constant 0 : i32
    %c0_i32_1 = arith.constant 0 : i32
    return %c0_i32, %c0_i32_0 : i32, i32
  }
  func.func @transform_6(%arg0: i32) -> (i32, i32) {
    %c0_i32 = arith.constant 0 : i32
    %c0_i32_0 = arith.constant 0 : i32
    return %arg0, %c0_i32 : i32, i32
  }
  func.func @transform_7(%arg0: i32) -> (i32, i32) {
    %c0_i32 = arith.constant 0 : i32
    %c0_i32_0 = arith.constant 0 : i32
    return %c0_i32, %arg0 : i32, i32
  }
}

</mosaic_0001>

<bundles_post_ra>
// kernel: tpu_custom_call.1
= control target key start
LH: loop header
LB: loop body
LE: loop exit
PB: predicated region body
PF: predicated region fallthrough
CT: control target
= control target key end

     0   :  { %13 = vsyncpa [#allocation3], 0  ;;  %vm38_vm0 = vcmask 261120   ;;  %v400_v1 = vmov 0.0   ;;  %vm401_vm1 = vmmov 0   ;;  %v402_v4 = vmov 0   ;;  %s496_s0 = inlined_call_operand.vmem [shape: f32[8,32], index: 0, kind: input, shape index: {}]   ;;  %s497_s1 = inlined_call_operand.vmem [shape: f32[8,32], index: 1, kind: input, shape index: {}]   ;;  %s498_s2 = inlined_call_operand.vmem [shape: f32[8,32], index: 2, kind: input, shape index: {}]   ;;  %s499_s3 = inlined_call_operand.vmem [shape: f32[8,1], index: 3, kind: input, shape index: {}]   ;;  %s500_s4 = inlined_call_operand.vmem [shape: f32[8,1], index: 4, kind: input, shape index: {}]   ;;  %s501_s5 = inlined_call_operand.vmem [shape: f32[8,8], index: 5, kind: input, shape index: {}]   ;;  %s502_s6 = inlined_call_operand.hbm [shape: f32[8,32], index: 6, kind: output, shape index: {0}]   ;;  %s503_s7 = inlined_call_operand.hbm [shape: f32[1,8], index: 7, kind: output, shape index: {1}]  }
   0x1   :  { %v450_v0 = vld [vmem:[%s496_s0] sm:$0xff]  ;;  %321 = vmatprep.subr.mxu0 %v400_v1  ;;  %323 = vmatprep.mubr.msk.f32.mxu0 %vm401_vm1, %v400_v1 }
   0x2   :  { %v30_v2 = vld [vmem:[%s499_s3] sm:$0xff]  ;;  %322 = vmatpush3.xpose.msk.msra.mxu0 %vm38_vm0, %v450_v0  ;;  %338 = vset.pattern.permute.xlu0 %v402_v4 }
   0x3   :  { %v28_v3 = vld [vmem:[%s497_s1] sm:$0xff] }
   0x4   :  { %14 = vsyncpa [#allocation5], 0  ;;  %35 = vperm.xlu0 %338, %v30_v2   ;;  %v32_v5 = vld [vmem:[%s501_s5] sm:$0xff]  ;;  %v403_v6 = vmov 1   ;;  %326 = vmatprep.subr.mxu1 %v400_v1  ;;  %v404_v7 = vmov 2   ;;  %v121_v14 = vlaneseq  ;;  %vm169_vm3 = vcmask 64512  }
   0x5   :  { %339 = vset.pattern.permute.xlu1 %v403_v6  ;;  %324 = vmatmul.mubr.msk.f32.vlgmr.msra.gmra.mrb[0].mxu0 %vm38_vm0, %v28_v3  ;;  %v31_v8 = vld [vmem:[%s500_s4] sm:$0xff]  ;;  %vm177_vm4 = vcmask 57344  }
   0x6   :  { %129 = vperm.xlu1 %339, %v32_v5   ;;  %328 = vmatprep.mubr.msk.f32.mxu1 %vm401_vm1, %v400_v1  ;;  %v29_v9 = vld [vmem:[%s498_s2] sm:$0xff]  ;;  %v122_v15 = vshrl.u32 %v121_v14, 7  ;;  %s405_s2 = smov [#allocation4]  }
   0x7   :  { %327 = vmatpush3.msra.mxu1 %v29_v9  ;;  %s302_s4 = sshll.u32 %s405_s2, 4  ;;  %s303_s4 = int_to_ptr.vmem [resolvable:$true] %s302_s4 }
   0x8   :  { %118 = vperm.xlu0 %338, %v32_v5   ;;  %v123_v16 = vsub.s32 0, %v122_v15  ;;  %v134_v22 = vsub.s32 1, %v122_v15  ;;  %v145_v28 = vsub.s32 2, %v122_v15  ;;  %vm165_vm2 = vcmp.lt.s32.totalorder %v122_v15, 4  ;;  %s352_s5 = scalar_lea.vmem %s303_s4, 16  ;;  %s356_s10 = scalar_lea.vmem %s303_s4, 32 }
   0x9   :  { %p353_p0 = scmp.ne.s32.totalorder %s303_s4, %s352_s5  ;;  %p357_p1 = scmp.lt.s32.totalorder %s303_s4, %s303_s4 }
   0xa   :  { %340 = vset.pattern.permute.xlu1 %v404_v7  ;;  %p358_p2 = scmp.lt.s32.totalorder %s356_s10, %s352_s5 }
   0xb   :  { %140 = vperm.xlu1 %340, %v32_v5  }
   0xc   :  { %p359_p3 = por %p358_p2, %p357_p1 }
   0xe   :  { %p360_p4 = pnand %p359_p3, %p353_p0 }
   0xf   :  { %341 = vset.pattern.permute.xlu1 %v402_v4 }
  0x10   :  { %156 = vperm.xlu1 %341, %v31_v8  }
  0x83   :  { %v36_v10 = vpop.permute.xlu0 %35 }
  0x85   :  { %v130_v24 = vpop.permute.xlu1 %129 }
  0x87   :  { %v119_v19 = vpop.permute.xlu0 %118 }
  0x8a   :  { %v141_v30 = vpop.permute.xlu1 %140 }
  0x8f   :  { %v157_v36 = vpop.permute.xlu1 %156 }
  0xd8   :  { %v111_v11 = vpop.f32.mrb[0].mxu0 }
  0xd9   :  { %v112_v12 = vadd.f32 %v111_v11, %v36_v10  ;;  %v325_v13 = vpop.f32.mrb[1].mxu0 }
  0xdb   :  { %342 = vtanh.f32 %v112_v12 }
  0xe5   :  { %v343_v17 = vpop.eup %342 }
  0xe6   :  { %v124_v18 = vrot.slane %v343_v17, %v123_v16 }
  0xe8   :  { %v125_v20 = vmul.f32 %v124_v18, %v119_v19 }
  0xea   :  { %v126_v21 = vadd.f32 %v125_v20, %v112_v12 }
  0xec   :  { %344 = vtanh.f32 %v126_v21 }
  0xf6   :  { %v345_v23 = vpop.eup %344 }
  0xf7   :  { %v135_v25 = vrot.slane %v345_v23, %v134_v22 }
  0xf9   :  { %v136_v26 = vmul.f32 %v135_v25, %v130_v24 }
  0xfb   :  { %v137_v27 = vadd.f32 %v136_v26, %v126_v21 }
  0xfd   :  { %346 = vtanh.f32 %v137_v27 }
 0x107   :  { %v347_v29 = vpop.eup %346 }
 0x108   :  { %v146_v31 = vrot.slane %v347_v29, %v145_v28 }
 0x10a   :  { %v147_v32 = vmul.f32 %v146_v31, %v141_v30 }
 0x10c   :  { %v148_v33 = vadd.f32 %v147_v32, %v137_v27 }
 0x10e   :  { %348 = vtanh.f32 %v148_v33 }
 0x118   :  { %v349_v34 = vpop.eup %348 }
 0x119   :  { %179 = vxpose.xlu0.b32.start.end [1/1] (short) (narrow) %v349_v34, 8  ;;  %v152_v35 = vmul.f32 %v349_v34, %v349_v34 }
 0x11b   :  { %v153_v37 = vsub.f32 1.0, %v152_v35 }
 0x11d   :  { %v159_v38 = vmul.f32 %v157_v36, %v153_v37 }
 0x11f   :  { %v160_v39 = vadd.f32 1.0, %v159_v38 }
 0x121   :  { %v161_v40 = vand.u32 2147483647, %v160_v39 }
 0x123   :  { %v162_v41 = vadd.f32 1e-08, %v161_v40 }
 0x125   :  { %350 = vlog2.f32 %v162_v41 }
 0x12f   :  { %v351_v42 = vpop.eup %350 }
 0x130   :  { %v164_v43 = vmul.f32 0.6931472, %v351_v42 }
 0x132   :  { %v168_v44 = vsel %vm165_vm2, %v164_v43, 0.0 }
 0x133   :  { %v170_v45 = vsel %vm169_vm3, %v168_v44, 0.0 }
 0x134   :  { %v171_v46 = vrot.slane %v170_v45, 4 }
 0x136   :  { %v172_v47 = vadd.f32 %v171_v46, %v170_v45 }
 0x138   :  { %v173_v48 = vrot.slane %v172_v47, 2 }
 0x13a   :  { %v174_v49 = vadd.f32 %v173_v48, %v172_v47 }
 0x13c   :  { %v175_v50 = vrot.slane %v174_v49, 1 }
 0x13e   :  { %v176_v51 = vadd.f32 %v175_v50, %v174_v49 }
 0x140   :  { %178 = vst.msk [vmem:[#allocation4] sm:$0x1] %vm177_vm4, %v176_v51 }
 0x199   :  { %v195_v52 = vpop.trf.xlu0 }
 0x19a   :  { %329 = vmatmul.mubr.msk.f32.vlgmr.msra.gmra.mrb[0].mxu1 %vm169_vm3, %v195_v52 }
 0x19b   :  { %363 = shalt.err (!%p360_p4)
}
 0x19c   :  { %s364_s13 = scalar_lea.hbm %s503_s7, 16 }
 0x19d   :  { %p365_p5 = scmp.ne.s32.totalorder %s503_s7, %s364_s13  ;;  %p368_p6 = scmp.lt.u32.totalorder %s364_s13, %s503_s7 }
 0x19f   :  { %p370_p7 = pnand %p368_p6, %p365_p5 }
 0x1a1   :  { %373 = shalt.err (!%p370_p7)
}
 0x1a2   :  { %305 = dma.vmem_to_hbm [thread:$0]  %s303_s4, 16, %s503_s7, [#allocation5]  }
 0x1a3   :  { %s406_s20 = smov [#allocation2]  }
 0x1a4   :  { %s292_s21 = sshll.u32 %s406_s20, 4  ;;  %s293_s21 = int_to_ptr.vmem [resolvable:$true] %s292_s21 }
 0x1a5   :  { %s374_s22 = scalar_lea.vmem %s293_s21, 128  ;;  %p379_p9 = scmp.lt.s32.totalorder %s293_s21, %s293_s21 }
 0x1a6   :  { %p375_p8 = scmp.ne.s32.totalorder %s293_s21, %s374_s22  ;;  %p380_p10 = scmp.lt.s32.totalorder %s374_s22, %s374_s22 }
 0x1a8   :  { %p381_p11 = por %p380_p10, %p379_p9 }
 0x1aa   :  { %p382_p12 = pnand %p381_p11, %p375_p8 }
 0x26d   :  { %v280_v53 = vpop.f32.mrb[0].mxu1 }
 0x26e   :  { %v284_v54 = vadd.f32 %v280_v53, %v450_v0  ;;  %v330_v55 = vpop.f32.mrb[1].mxu1 }
 0x270   :  { %285 = vst.msk [vmem:[#allocation2] sm:$0xff] %vm38_vm0, %v284_v54 }
 0x271   :  { %385 = shalt.err (!%p382_p12)
}
 0x272   :  { %s386_s7 = scalar_lea.hbm %s502_s6, 128 }
 0x273   :  { %p387_p13 = scmp.ne.s32.totalorder %s502_s6, %s386_s7  ;;  %p390_p0 = scmp.lt.u32.totalorder %s386_s7, %s502_s6 }
 0x275   :  { %p392_p1 = pnand %p390_p0, %p387_p13 }
 0x277   :  { %395 = shalt.err (!%p392_p1)
}
 0x278   :  { %295 = dma.vmem_to_hbm [thread:$0]  %s293_s21, 128, %s502_s6, [#allocation3]  }
 0x279   :  { %396 = dma.done.wait [#allocation3], 128  }
 0x27a   :  { %397 = vsyncadd [#allocation3], 4294967168 }
 0x27b   :  { %398 = dma.done.wait [#allocation5], 16  }
 0x27c   :  { %399 = vsyncadd [#allocation5], 4294967280 }
 0x27d   :  { %312 = vsyncpa [#allocation3], 1 }
 0x27e   :  { %313 = vsyncpa [#allocation5], 1 }

</bundles_post_ra>
